<compile_context>
chip_gen: v6e
topology: v6e:2x2x1
jax: 0.10.0
libtpu: 0.0.40
codegen_flags: <defaults>
</compile_context>

<pallas_src>
import functools

import jax
import jax.numpy as jnp
from jax import lax
from jax.experimental import pallas as pl
from jax.experimental.pallas import tpu as pltpu


def _round_up(x, m):
    return ((x + m - 1) // m) * m


def _focal_loss_kernel(preds_ref, labels_ref, out_ref, *, n_valid, gamma):
    """One grid step: one (tb, C) row tile -> one (8, 128) partial-sum block.

    The tile's partial loss sum is stored at [0, 0] of its output block (zeros
    elsewhere), so the wrapper finishes with a plain jnp.sum over a tiny array.
    """
    step = pl.program_id(0)

    logits = preds_ref[...].astype(jnp.float32)               # (tb, C), upcast on load
    tb, c = logits.shape

    # Numerically stable log-softmax along the class (lane) axis.
    m = jnp.max(logits, axis=1, keepdims=True)                # XLU lane reduce
    z = logits - m
    ez = jnp.exp(z)                                           # EUP: one exp / element
    sum_exp = jnp.sum(ez, axis=1, keepdims=True)              # (tb, 1)
    lse = jnp.log(sum_exp)                                    # EUP: one log / row

    # torch.gather(dim=1, index=labels): compare-against-iota selection, no
    # materialized f32 one-hot.
    cols = lax.broadcasted_iota(jnp.int32, (tb, c), 1)
    sel = cols == labels_ref[...]                             # (tb, C) bool
    tgt_z = jnp.sum(jnp.where(sel, z, 0.0), axis=1, keepdims=True)
    tgt_ez = jnp.sum(jnp.where(sel, ez, 0.0), axis=1, keepdims=True)

    logpt = tgt_z - lse                                       # gathered log-softmax
    pt = tgt_ez / sum_exp                                     # == exp(logpt), no extra exp

    om = 1.0 - pt
    g = float(gamma)
    if g == 2.0:                                              # module default: pure VPU
        w = om * om
    elif g == 1.0:
        w = om
    elif g == 0.0:
        w = jnp.ones_like(om)
    else:
        w = jnp.power(om, g)                                  # generic gamma
    row_loss = -(w * logpt)                                   # (tb, 1)

    # Rows beyond the real batch (edge block) may hold garbage / NaN logits:
    # mask with where (NaN-safe), not a multiply.
    row_ids = step * tb + lax.broadcasted_iota(jnp.int32, (tb, 1), 0)
    row_loss = jnp.where(row_ids < n_valid, row_loss, 0.0)
    partial = jnp.sum(row_loss)                               # scalar f32

    r8 = lax.broadcasted_iota(jnp.int32, (8, 128), 0)
    c8 = lax.broadcasted_iota(jnp.int32, (8, 128), 1)
    out_ref[...] = jnp.where((r8 == 0) & (c8 == 0), partial, 0.0)


def _choose_row_tile(c, itemsize, pack):
    """Row tile sized from C: ~2 MiB of logits per step, capped by a VMEM
    budget that is safe on v7x (64 MiB physical / 48 MiB limit below)."""
    target = _round_up(max(1, (2 * 1024 * 1024) // max(1, c * itemsize)), pack)
    # Per-row VMEM estimate: 2 double-buffered input copies + ~6 f32 full-tile
    # intermediates + the lane-padded (x128) int32 label buffers.
    bytes_per_row = c * (2 * itemsize + 24) + 2 * 128 * 4
    cap = max(pack, (28 * 1024 * 1024) // bytes_per_row // pack * pack)
    return max(pack, min(target, cap))


def focal_loss_forward(preds, labels, *, alpha=0.25, gamma=2.0,
                       num_classes=None, size_average=True,
                       row_tile=None, interpret=False):
    """JAX/Pallas equivalent of focal_loss.forward(preds, labels) -> scalar."""
    del alpha, num_classes   # alpha is never used by the reference forward

    x = jnp.squeeze(preds)                                    # preds.squeeze()
    if x.ndim != 2:
        # TODO(synk): B==1 collapses the batch dim like PyTorch's .squeeze();
        # that ambiguous case is rejected here instead of proceeding.
        raise ValueError(f"expected 2-D logits after squeeze, got {x.shape}")

    lbl = jnp.asarray(labels)
    if lbl.ndim == 1:
        lbl = lbl[:, None]
    if lbl.ndim != 2 or lbl.shape[1] != 1:
        # TODO(synk): reference gather supports (B, K) indices; only K=1 (the
        # CLIP2PointCIL training case) is implemented.
        raise NotImplementedError("labels must have shape (B,) or (B, 1)")
    lbl = lbl.astype(jnp.int32)

    b, c = x.shape
    itemsize = int(jnp.dtype(x.dtype).itemsize)
    pack = {4: 8, 2: 16, 1: 32}.get(itemsize, 8)              # sublane pack per dtype

    if row_tile is None:
        tb = _choose_row_tile(c, itemsize, pack)
    else:
        tb = _round_up(int(row_tile), pack)
    if tb >= b:
        tb = b              # single tile spanning the batch (block == full dims)
    num_tiles = (b + tb - 1) // tb

    kernel = functools.partial(_focal_loss_kernel, n_valid=b, gamma=float(gamma))

    partials = pl.pallas_call(
        kernel,
        out_shape=jax.ShapeDtypeStruct((num_tiles * 8, 128), jnp.float32),
        grid=(num_tiles,),
        in_specs=[
            pl.BlockSpec((tb, c), lambda i: (i, 0)),          # logits tile (caller dtype)
            pl.BlockSpec((tb, 1), lambda i: (i, 0)),          # labels tile (int32)
        ],
        out_specs=pl.BlockSpec((8, 128), lambda i: (i, 0)),   # per-tile partial block
        compiler_params=pltpu.CompilerParams(
            dimension_semantics=("parallel",),                # megacore-friendly on v7x
            vmem_limit_bytes=48 * 1024 * 1024),
        interpret=interpret,
    )(x, lbl)

    total = jnp.sum(partials)                                 # tiny final reduction
    return total / b if size_average else total


class FocalLoss:
    """Thin mirror of the PyTorch module's constructor signature."""

    def __init__(self, alpha=0.25, gamma=2, num_classes=3, size_average=True):
        self.alpha = [alpha] * num_classes    # kept for fidelity; unused in forward
        self.gamma = float(gamma)
        self.size_average = size_average

    def __call__(self, preds, labels):
        return focal_loss_forward(preds, labels, gamma=self.gamma,
                                  size_average=self.size_average)


def reference_focal_loss(preds, labels, *, gamma=2.0, size_average=True):
    """Plain-JAX reference mirroring the PyTorch forward."""
    x = jnp.squeeze(preds).astype(jnp.float32)
    logsoft = jax.nn.log_softmax(x, axis=1)
    lbl = jnp.asarray(labels).reshape(-1, 1).astype(jnp.int32)
    logpt = jnp.take_along_axis(logsoft, lbl, axis=1)         # (B, 1)
    pt = jnp.exp(logpt)
    loss = -((1.0 - pt) ** gamma) * logpt
    return loss.mean() if size_average else loss.sum()


if __name__ == "__main__":
    key = jax.random.PRNGKey(0)
    kp, kl, kp2, kl2 = jax.random.split(key, 4)

    # CLIP2PointCIL-style usage: logits (B, num_cls, 1), integer labels (B, 1).
    # B deliberately not a multiple of 8 to exercise the sub-tile full-dim path.
    batch, num_classes = 6, 10
    preds = jax.random.normal(kp, (batch, num_classes, 1), jnp.float32)
    labels = jax.random.randint(kl, (batch, 1), 0, num_classes, dtype=jnp.int32)

    crit = FocalLoss(alpha=0.25, gamma=2, num_classes=num_classes,
                     size_average=True)
    loss = jax.block_until_ready(crit(preds, labels))
    ref = jax.block_until_ready(
        reference_focal_loss(preds, labels, gamma=2.0, size_average=True))
    assert loss.shape == (), loss.shape
    assert jnp.allclose(loss, ref, rtol=1e-4, atol=1e-5), (loss, ref)

    # size_average=False (sum) path.
    loss_sum = jax.block_until_ready(
        focal_loss_forward(preds, labels, gamma=2.0, size_average=False))
    ref_sum = jax.block_until_ready(
        reference_focal_loss(preds, labels, gamma=2.0, size_average=False))
    assert jnp.allclose(loss_sum, ref_sum, rtol=1e-4, atol=1e-5), (loss_sum, ref_sum)

    # bf16 logits, B not a multiple of the tile, forced multi-tile grid to
    # exercise the edge-block row mask and the parallel partial-sum outputs.
    b2, c2 = 37, 16
    preds2 = jax.random.normal(kp2, (b2, c2), jnp.float32).astype(jnp.bfloat16)
    labels2 = jax.random.randint(kl2, (b2, 1), 0, c2, dtype=jnp.int32)
    loss2 = jax.block_until_ready(
        focal_loss_forward(preds2, labels2, gamma=2.0, size_average=True,
                           row_tile=16))
    ref2 = jax.block_until_ready(
        reference_focal_loss(preds2, labels2, gamma=2.0, size_average=True))
    assert jnp.allclose(loss2, ref2, rtol=1e-3, atol=1e-4), (loss2, ref2)

    print("KERNEL_OK")
</pallas_src>

<mosaic_0001>
module attributes {stable_mosaic.version = 11 : i64} {
  func.func @_focal_loss_kernel(%arg0: i32, %arg1: memref<6x10xf32, #tpu.memory_space<vmem>>, %arg2: memref<6x1xi32, #tpu.memory_space<vmem>>, %arg3: memref<8x128xf32, #tpu.memory_space<vmem>>) attributes {dimension_semantics = [#tpu.dimension_semantics<parallel>], iteration_bounds = array<i64: 1>, scalar_prefetch = 0 : i64, scratch_operands = 0 : i64, tpu.core_type = #tpu.core_type<tc>, window_params = [{transform_indices = @transform_0, window_bounds = array<i64: 6, 10>}, {transform_indices = @transform_1, window_bounds = array<i64: 6, 1>}, {transform_indices = @transform_2, window_bounds = array<i64: 8, 128>}]} {
    %c0 = arith.constant 0 : index
    %c0_0 = arith.constant 0 : index
    %0 = vector.load %arg1[%c0, %c0_0] : memref<6x10xf32, #tpu.memory_space<vmem>>, vector<6x10xf32>
    %cst = arith.constant dense<0xFF800000> : vector<6xf32>
    %1 = vector.multi_reduction <maximumf>, %0, %cst [1] : vector<6x10xf32> to vector<6xf32>
    %2 = vector.shape_cast %1 : vector<6xf32> to vector<6x1xf32>
    %3 = vector.broadcast %2 : vector<6x1xf32> to vector<6x10xf32>
    %4 = arith.subf %0, %3 : vector<6x10xf32>
    %5 = math.exp %4 : vector<6x10xf32>
    %cst_1 = arith.constant dense<0.000000e+00> : vector<6xf32>
    %6 = vector.multi_reduction <add>, %5, %cst_1 [1] : vector<6x10xf32> to vector<6xf32>
    %7 = vector.shape_cast %6 : vector<6xf32> to vector<6x1xf32>
    %8 = math.log %7 : vector<6x1xf32>
    %9 = tpu.iota {dimensions = array<i32: 1>} : vector<6x10xi32>
    %c0_2 = arith.constant 0 : index
    %c0_3 = arith.constant 0 : index
    %10 = vector.load %arg2[%c0_2, %c0_3] : memref<6x1xi32, #tpu.memory_space<vmem>>, vector<6x1xi32>
    %11 = vector.broadcast %10 : vector<6x1xi32> to vector<6x10xi32>
    %12 = arith.cmpi eq, %9, %11 : vector<6x10xi32>
    %cst_4 = arith.constant 0.000000e+00 : f32
    %13 = vector.broadcast %cst_4 : f32 to vector<6x10xf32>
    %14 = arith.select %12, %4, %13 : vector<6x10xi1>, vector<6x10xf32>
    %cst_5 = arith.constant dense<0.000000e+00> : vector<6xf32>
    %15 = vector.multi_reduction <add>, %14, %cst_5 [1] : vector<6x10xf32> to vector<6xf32>
    %16 = vector.shape_cast %15 : vector<6xf32> to vector<6x1xf32>
    %cst_6 = arith.constant 0.000000e+00 : f32
    %17 = vector.broadcast %cst_6 : f32 to vector<6x10xf32>
    %18 = arith.select %12, %5, %17 : vector<6x10xi1>, vector<6x10xf32>
    %cst_7 = arith.constant dense<0.000000e+00> : vector<6xf32>
    %19 = vector.multi_reduction <add>, %18, %cst_7 [1] : vector<6x10xf32> to vector<6xf32>
    %20 = vector.shape_cast %19 : vector<6xf32> to vector<6x1xf32>
    %21 = arith.subf %16, %8 : vector<6x1xf32>
    %22 = arith.divf %20, %7 : vector<6x1xf32>
    %cst_8 = arith.constant 1.000000e+00 : f32
    %23 = vector.broadcast %cst_8 : f32 to vector<6x1xf32>
    %24 = arith.subf %23, %22 : vector<6x1xf32>
    %25 = arith.mulf %24, %24 : vector<6x1xf32>
    %26 = arith.mulf %25, %21 : vector<6x1xf32>
    %cst_9 = arith.constant 0.000000e+00 : f32
    %27 = vector.broadcast %cst_9 : f32 to vector<6x1xf32>
    %28 = arith.subf %27, %26 : vector<6x1xf32>
    %c6_i32 = arith.constant 6 : i32
    %29 = arith.muli %arg0, %c6_i32 : i32
    %30 = tpu.iota {dimensions = array<i32: 0>} : vector<6x1xi32>
    %31 = vector.broadcast %29 : i32 to vector<6x1xi32>
    %32 = arith.addi %31, %30 : vector<6x1xi32>
    %c6_i32_10 = arith.constant 6 : i32
    %33 = vector.broadcast %c6_i32_10 : i32 to vector<6x1xi32>
    %34 = arith.cmpi slt, %32, %33 : vector<6x1xi32>
    %cst_11 = arith.constant 0.000000e+00 : f32
    %35 = vector.broadcast %cst_11 : f32 to vector<6x1xf32>
    %36 = arith.select %34, %28, %35 : vector<6x1xi1>, vector<6x1xf32>
    %37 = vector.shape_cast %36 : vector<6x1xf32> to vector<1x6x1xf32>
    %cst_12 = arith.constant dense<0.000000e+00> : vector<1xf32>
    %38 = vector.multi_reduction <add>, %37, %cst_12 [1, 2] : vector<1x6x1xf32> to vector<1xf32>
    %39 = vector.shape_cast %38 : vector<1xf32> to vector<1x1x1xf32>
    %40 = vector.extract %39[0, 0, 0] : f32 from vector<1x1x1xf32>
    %41 = tpu.iota {dimensions = array<i32: 0>} : vector<8x128xi32>
    %42 = tpu.iota {dimensions = array<i32: 1>} : vector<8x128xi32>
    %c0_i32 = arith.constant 0 : i32
    %43 = vector.broadcast %c0_i32 : i32 to vector<8x128xi32>
    %44 = arith.cmpi eq, %41, %43 : vector<8x128xi32>
    %c0_i32_13 = arith.constant 0 : i32
    %45 = vector.broadcast %c0_i32_13 : i32 to vector<8x128xi32>
    %46 = arith.cmpi eq, %42, %45 : vector<8x128xi32>
    %47 = arith.andi %44, %46 : vector<8x128xi1>
    %cst_14 = arith.constant 0.000000e+00 : f32
    %48 = vector.broadcast %40 : f32 to vector<8x128xf32>
    %49 = vector.broadcast %cst_14 : f32 to vector<8x128xf32>
    %50 = arith.select %47, %48, %49 : vector<8x128xi1>, vector<8x128xf32>
    %c0_15 = arith.constant 0 : index
    %c0_16 = arith.constant 0 : index
    %51 = vector.load %arg3[%c0_15, %c0_16] : memref<8x128xf32, #tpu.memory_space<vmem>>, vector<8x128xf32>
    tpu.vector_store %arg3[%c0_15, %c0_16], %50 {strides = array<i32>} : memref<8x128xf32, #tpu.memory_space<vmem>>, vector<8x128xf32>,
    return
  }
  func.func @transform_0(%arg0: i32) -> (i32, i32) {
    %c0_i32 = arith.constant 0 : i32
    %c0_i32_0 = arith.constant 0 : i32
    return %arg0, %c0_i32 : i32, i32
  }
  func.func @transform_1(%arg0: i32) -> (i32, i32) {
    %c0_i32 = arith.constant 0 : i32
    %c0_i32_0 = arith.constant 0 : i32
    return %arg0, %c0_i32 : i32, i32
  }
  func.func @transform_2(%arg0: i32) -> (i32, i32) {
    %c0_i32 = arith.constant 0 : i32
    %c0_i32_0 = arith.constant 0 : i32
    return %arg0, %c0_i32 : i32, i32
  }
}

</mosaic_0001>

<bundles_post_ra>
// kernel: tpu_custom_call.1
= control target key start
LH: loop header
LB: loop body
LE: loop exit
PB: predicated region body
PF: predicated region fallthrough
CT: control target
= control target key end

     0   :  { %vm13_vm0 = vcmask 78848   ;;  %v118_v2 = vmov 0   ;;  %s148_s0 = inlined_call_operand.vmem [shape: f32[6,10], index: 0, kind: input, shape index: {}]   ;;  %s149_s1 = inlined_call_operand.vmem [shape: s32[6,1], index: 1, kind: input, shape index: {}]   ;;  %s150_s2 = inlined_call_operand.hbm [shape: f32[8,128], index: 2, kind: output, shape index: {}]  }
   0x1   :  { %v12_v0 = vld [vmem:[%s148_s0] sm:$0x3f]  ;;  %89 = vset.pattern.permute.xlu0 %v118_v2 }
   0x2   :  { %v14_v1 = vsel %vm13_vm0, %v12_v0, -inf }
   0x3   :  { %7 = vsyncpa [#allocation3], 0  ;;  %15 = vmax.xlane.f32.xlu0 %v14_v1  ;;  %v27_v3 = vld [vmem:[%s149_s1] sm:$0x3f]  ;;  %v25_v7 = vlaneseq  ;;  %vm54_vm3 = vcmask 5120   ;;  %s119_s0 = smov [#allocation2]  }
   0x4   :  { %s77_s1 = sshll.u32 %s119_s0, 4  ;;  %s78_s1 = int_to_ptr.vmem [resolvable:$true] %s77_s1 }
   0x5   :  { %v26_v8 = vand.u32 127, %v25_v7  ;;  %v49_v24 = vshrl.u32 %v25_v7, 7  ;;  %s96_s14 = scalar_lea.vmem %s78_s1, 128  ;;  %p101_p1 = scmp.lt.s32.totalorder %s78_s1, %s78_s1 }
   0x6   :  { %p97_p0 = scmp.ne.s32.totalorder %s78_s1, %s96_s14  ;;  %p102_p2 = scmp.lt.s32.totalorder %s96_s14, %s96_s14 }
   0x7   :  { %vm52_vm2 = vcmp.lt.s32.totalorder %v49_v24, 6  ;;  %vm65_vm4 = vcmp.eq.s32.totalorder %v49_v24, 0  ;;  %vm66_vm5 = vcmp.eq.s32.totalorder %v26_v8, 0 }
   0x8   :  { %vm67_vm6 = vmand %vm65_vm4, %vm66_vm5  ;;  %p103_p3 = por %p102_p2, %p101_p1 }
   0xa   :  { %p104_p4 = pnand %p103_p3, %p97_p0 }
  0x19   :  { %29 = vperm.xlu0 %89, %v27_v3  }
  0x8c   :  { %v16_v4 = vpop.xlane.xlu0 %15 }
  0x8d   :  { %v17_v5 = vsub.f32 %v12_v0, %v16_v4 }
  0x8f   :  { %v18_v6 = vmul.f32 1.442695, %v17_v5 }
  0x91   :  { %90 = vpow2.f32 %v18_v6 }
  0x94   :  { %v30_v9 = vpop.permute.xlu0 %29 }
  0x95   :  { %vm31_vm1 = vcmp.eq.s32.totalorder %v26_v8, %v30_v9 }
  0x96   :  { %v32_v14 = vsel %vm31_vm1, %v17_v5, 0.0 }
  0x97   :  { %v33_v15 = vsel %vm13_vm0, %v32_v14, 0.0 }
  0x9e   :  { %v91_v10 = vpop.eup %90 }
  0x9f   :  { %v20_v11 = vsel %vm13_vm0, %v91_v10, 0.0  ;;  %v36_v12 = vsel %vm31_vm1, %v91_v10, 0.0 }
  0xa0   :  { %21 = vadd.xlane.f32.xlu1 %v20_v11  ;;  %v37_v13 = vsel %vm13_vm0, %v36_v12, 0.0 }
  0xa4   :  { %38 = vadd.xlane.f32.xlu1 %v37_v13 }
  0xa8   :  { %34 = vadd.xlane.f32.xlu1 %v33_v15 }
 0x129   :  { %v22_v16 = vpop.xlane.xlu1 %21 }
 0x12a   :  { %92 = vlog2.f32 %v22_v16 }
 0x12b   :  { %94 = vrcp.f32 %v22_v16 }
 0x12d   :  { %v39_v17 = vpop.xlane.xlu1 %38 }
 0x131   :  { %v35_v23 = vpop.xlane.xlu1 %34 }
 0x137   :  { %v93_v18 = vpop.eup %92 }
 0x138   :  { %v95_v19 = vpop.eup %94  ;;  %v24_v21 = vmul.f32 0.6931472, %v93_v18 }
 0x139   :  { %v42_v20 = vmul.f32 %v95_v19, %v39_v17 }
 0x13a   :  { %v40_v26 = vsub.f32 %v35_v23, %v24_v21 }
 0x13b   :  { %v43_v22 = vsub.f32 1.0, %v42_v20 }
 0x13d   :  { %v44_v25 = vmul.f32 %v43_v22, %v43_v22 }
 0x13f   :  { %v45_v27 = vmul.f32 %v44_v25, %v40_v26 }
 0x141   :  { %v46_v28 = vsub.f32 0.0, %v45_v27 }
 0x143   :  { %v53_v29 = vsel %vm52_vm2, %v46_v28, 0.0 }
 0x144   :  { %v55_v30 = vsel %vm54_vm3, %v53_v29, 0.0 }
 0x145   :  { %56 = vadd.xlane.f32.xlu1 %v55_v30 }
 0x1ce   :  { %v57_v31 = vpop.xlane.xlu1 %56 }
 0x1cf   :  { %v58_v32 = vrot.slane %v57_v31, 4 }
 0x1d1   :  { %v59_v33 = vadd.f32 %v58_v32, %v57_v31 }
 0x1d3   :  { %v60_v34 = vrot.slane %v59_v33, 2 }
 0x1d5   :  { %v61_v35 = vadd.f32 %v60_v34, %v59_v33 }
 0x1d7   :  { %v62_v36 = vrot.slane %v61_v35, 1 }
 0x1d9   :  { %v63_v37 = vadd.f32 %v62_v36, %v61_v35 }
 0x1db   :  { %85 = vpush %v63_v37 }
 0x20c   :  { %s86_s13 = spop %85 }
 0x20d   :  { %v68_v38 = vstv %s86_s13 }
 0x20e   :  { %v69_v39 = vsel %vm67_vm6, %v68_v38, 0.0 }
 0x20f   :  { %70 = vst [vmem:[#allocation2] sm:$0xff] %v69_v39 }
 0x210   :  { %107 = shalt.err (!%p104_p4)
}
 0x211   :  { %80 = dma.vmem_to_hbm [thread:$0]  %s78_s1, 128, %s150_s2, [#allocation3]  }
 0x212   :  { %116 = dma.done.wait [#allocation3], 128  }
 0x213   :  { %117 = vsyncadd [#allocation3], 4294967168 }
 0x214   :  { %84 = vsyncpa [#allocation3], 1 }

</bundles_post_ra>
